<compile_context>
chip_gen: v5e
topology: v5e:2x2
jax: 0.10.0
libtpu: 0.0.40
codegen_flags: <defaults>
</compile_context>

<pallas_src>
import numpy as np
import jax
import jax.numpy as jnp
from jax.experimental import pallas as pl
from jax.experimental.pallas import tpu as pltpu

EPS = 1e-5                      # python float (never captured as a traced const)
LANE = 128                      # TPU lane width
H0, H1, NCLS = 100, 50, 10
NEG_BIG = -1e30                 # python float; folded into b2 padding host-side
MATMUL_DTYPE = jnp.float32      # set to jnp.bfloat16 at training batch sizes


def _round_up(n, m):
    return ((n + m - 1) // m) * m


# ----------------------------------------------------------------------------
# Kernel: whole network in one invocation (single full-array VMEM block).
# Operands:
#   x_ref    : (B, Kp)    f32   activations (Kp = image_size rounded to 128)
#   w0_ref   : (Kp, 128)  f32   fc0 weight (zero-padded)
#   w12_ref  : (128, 256) f32   [w1 | w2] concatenated along lanes
#   vecs_ref : (8, 128)   f32   rows: g0, be0, g1, be1, b2(+mask), 0, 0, 0
# Padded gamma columns are zero, so padded hidden lanes stay exactly 0 through
# BN/ReLU; padded b2 lanes are -1e30, so log_softmax ignores them.
# ----------------------------------------------------------------------------
def thirdnet_kernel(x_ref, w0_ref, w12_ref, vecs_ref, out_ref):
    x = x_ref[...]                                   # (B, Kp) f32
    inv_b = 1.0 / x.shape[0]                         # static python float
    dt = MATMUL_DTYPE

    g0 = vecs_ref[0:1, :]
    be0 = vecs_ref[1:2, :]
    g1 = vecs_ref[2:3, :]
    be1 = vecs_ref[3:4, :]
    b2 = vecs_ref[4:5, :]                            # includes padded-class mask
    w1 = w12_ref[:, :LANE]
    w2 = w12_ref[:, LANE:]

    # ---- fc0 (bias cancels under train-mode BN) + BN(100) + ReLU -----------
    h = jnp.dot(x.astype(dt), w0_ref[...].astype(dt),
                preferred_element_type=jnp.float32)
    mu = jnp.sum(h, axis=0, keepdims=True) * inv_b
    var = jnp.sum(h * h, axis=0, keepdims=True) * inv_b - mu * mu
    s = g0 * jax.lax.rsqrt(var + EPS)                # folded BN scale (EUP rsqrt)
    t = be0 - mu * s                                 # folded BN shift
    h = jnp.maximum(h * s + t, 0.0)

    # ---- fc1 (bias cancels) + BN(50) + ReLU ---------------------------------
    h = jnp.dot(h.astype(dt), w1.astype(dt), preferred_element_type=jnp.float32)
    mu = jnp.sum(h, axis=0, keepdims=True) * inv_b
    var = jnp.sum(h * h, axis=0, keepdims=True) * inv_b - mu * mu
    s = g1 * jax.lax.rsqrt(var + EPS)
    t = be1 - mu * s
    h = jnp.maximum(h * s + t, 0.0)

    # ---- fc2 + log_softmax (padded-class mask already folded into b2) ------
    logits = jnp.dot(h.astype(dt), w2.astype(dt),
                     preferred_element_type=jnp.float32) + b2
    m = jnp.max(logits, axis=1, keepdims=True)
    z = logits - m
    lse = jnp.log(jnp.sum(jnp.exp(z), axis=1, keepdims=True))
    out_ref[...] = z - lse                           # (B, 128) lane-dense store


# ----------------------------------------------------------------------------
# Parameter init (PyTorch-equivalent, unpadded).
# ----------------------------------------------------------------------------
def init_params(key, image_size):
    """Mirror nn.Linear (U(-1/sqrt(fan_in), +1/sqrt(fan_in))) and nn.BatchNorm1d
    defaults (gamma=1, beta=0).  Weights stored (in, out) so forward is x @ W."""
    ks = jax.random.split(key, 6)

    def linear(kw, kb, fan_in, fan_out):
        bound = 1.0 / np.sqrt(fan_in)
        w = jax.random.uniform(kw, (fan_in, fan_out), jnp.float32, -bound, bound)
        b = jax.random.uniform(kb, (fan_out,), jnp.float32, -bound, bound)
        return w, b

    w0, b0 = linear(ks[0], ks[1], image_size, H0)
    w1, b1 = linear(ks[2], ks[3], H0, H1)
    w2, b2 = linear(ks[4], ks[5], H1, NCLS)
    return dict(
        w0=w0, b0=b0, g0=jnp.ones((H0,), jnp.float32), be0=jnp.zeros((H0,), jnp.float32),
        w1=w1, b1=b1, g1=jnp.ones((H1,), jnp.float32), be1=jnp.zeros((H1,), jnp.float32),
        w2=w2, b2=b2,
    )


def pad_params(p, image_size):
    """Zero-pad every feature dim to the 128-lane width (done once, off the hot
    path), pack the five per-feature vectors into one (8,128) tile, concat
    w1|w2, and fold the padded-class mask into b2."""
    kp = _round_up(image_size, LANE)

    def pad2(w, rows, cols):
        return jnp.pad(w, ((0, rows - w.shape[0]), (0, cols - w.shape[1])))

    w0 = pad2(p["w0"], kp, LANE)
    w12 = jnp.concatenate([pad2(p["w1"], LANE, LANE),
                           pad2(p["w2"], LANE, LANE)], axis=1)    # (128, 256)

    b2 = jnp.full((LANE,), NEG_BIG, jnp.float32).at[:NCLS].set(p["b2"])
    vecs = jnp.zeros((8, LANE), jnp.float32)
    vecs = vecs.at[0, :H0].set(p["g0"])
    vecs = vecs.at[1, :H0].set(p["be0"])
    vecs = vecs.at[2, :H1].set(p["g1"])
    vecs = vecs.at[3, :H1].set(p["be1"])
    vecs = vecs.at[4, :].set(b2)
    return dict(w0=w0, w12=w12, vecs=vecs)


# ----------------------------------------------------------------------------
# Wrapper.  Returns the full lane-dense (B, 128) log-softmax; the consumer
# (loss / argmax) gathers the NCLS real class columns.
# ----------------------------------------------------------------------------
def thirdnet_forward(x, pp):
    B, K = x.shape
    kp = pp["w0"].shape[0]
    if kp != K:
        # TODO(synk): at batch scale, guarantee K % 128 == 0 upstream (or DMA
        # unpadded x into a zero-initialized VMEM scratch) to avoid this extra
        # HBM read+write of the activations.
        x = jnp.pad(x, ((0, 0), (0, kp - K)))

    cost = pl.CostEstimate(
        flops=2 * B * (kp * LANE + LANE * LANE + LANE * LANE),
        transcendentals=B * LANE + 2 * LANE + B,    # exp rows + 2x rsqrt + log
        bytes_accessed=4 * (B * kp + kp * LANE + LANE * 2 * LANE
                            + 8 * LANE + B * LANE),
    )
    vmem = lambda: pl.BlockSpec(memory_space=pltpu.MemorySpace.VMEM)

    return pl.pallas_call(
        thirdnet_kernel,
        out_shape=jax.ShapeDtypeStruct((B, LANE), jnp.float32),
        in_specs=[vmem() for _ in range(4)],
        out_specs=vmem(),
        cost_estimate=cost,
        # Tiny problem: whole-array single block, no grid.  See header TODO for
        # the large-B batch-grid / v7x tiling plan.
    )(x, pp["w0"], pp["w12"], pp["vecs"])


# ----------------------------------------------------------------------------
# Pure-JAX reference (keeps the fc0/fc1 biases; must match the kernel exactly
# because train-mode BN cancels them).
# ----------------------------------------------------------------------------
def thirdnet_ref(x, p):
    h = x @ p["w0"] + p["b0"]
    mu = h.mean(0, keepdims=True); var = ((h - mu) ** 2).mean(0, keepdims=True)
    h = jnp.maximum((h - mu) / jnp.sqrt(var + EPS) * p["g0"] + p["be0"], 0.0)
    h = h @ p["w1"] + p["b1"]
    mu = h.mean(0, keepdims=True); var = ((h - mu) ** 2).mean(0, keepdims=True)
    h = jnp.maximum((h - mu) / jnp.sqrt(var + EPS) * p["g1"] + p["be1"], 0.0)
    logits = h @ p["w2"] + p["b2"]
    return jax.nn.log_softmax(logits, axis=1)


if __name__ == "__main__":
    key = jax.random.PRNGKey(0)
    k_x, k_p = jax.random.split(key)

    # Small "image" batch: 8 images of 1x16x16  ->  image_size = 256.
    B, C, H, W = 8, 1, 16, 16
    image_size = C * H * W
    x_img = jax.random.normal(k_x, (B, C, H, W), jnp.float32)
    x = x_img.reshape(-1, image_size)          # == torch x.view(-1, image_size)

    params = init_params(k_p, image_size)      # PyTorch-equivalent params
    padded = pad_params(params, image_size)    # lane-padded / packed, done once

    out_full = thirdnet_forward(x, padded)     # (B, 128) lane-dense
    out_full = jax.block_until_ready(out_full)
    out = np.asarray(out_full)[:, :NCLS]       # consumer-side class gather

    ref = np.asarray(thirdnet_ref(x, params))
    assert out.shape == (B, NCLS)
    np.testing.assert_allclose(out, ref, rtol=1e-4, atol=1e-4)
    # log_softmax rows should sum to ~1 in prob space (padded lanes contribute 0)
    np.testing.assert_allclose(np.exp(np.asarray(out_full)).sum(axis=1),
                               np.ones(B), atol=1e-4)

    print("KERNEL_OK")
</pallas_src>

<mosaic_0001>
module attributes {stable_mosaic.version = 11 : i64} {
  func.func @thirdnet_kernel(%arg0: memref<8x256xf32, #tpu.memory_space<vmem>>, %arg1: memref<256x128xf32, #tpu.memory_space<vmem>>, %arg2: memref<128x256xf32, #tpu.memory_space<vmem>>, %arg3: memref<8x128xf32, #tpu.memory_space<vmem>>, %arg4: memref<8x128xf32, #tpu.memory_space<vmem>>) attributes {dimension_semantics = [], scalar_prefetch = 0 : i64, scratch_operands = 0 : i64, tpu.core_type = #tpu.core_type<tc>} {
    %c0 = arith.constant 0 : index
    %c0_0 = arith.constant 0 : index
    %0 = vector.load %arg0[%c0, %c0_0] : memref<8x256xf32, #tpu.memory_space<vmem>>, vector<8x256xf32>
    %c0_1 = arith.constant 0 : index
    %c0_2 = arith.constant 0 : index
    %1 = vector.load %arg3[%c0_1, %c0_2] : memref<8x128xf32, #tpu.memory_space<vmem>>, vector<1x128xf32>
    %c1 = arith.constant 1 : index
    %c0_3 = arith.constant 0 : index
    %2 = vector.load %arg3[%c1, %c0_3] : memref<8x128xf32, #tpu.memory_space<vmem>>, vector<1x128xf32>
    %c2 = arith.constant 2 : index
    %c0_4 = arith.constant 0 : index
    %3 = vector.load %arg3[%c2, %c0_4] : memref<8x128xf32, #tpu.memory_space<vmem>>, vector<1x128xf32>
    %c3 = arith.constant 3 : index
    %c0_5 = arith.constant 0 : index
    %4 = vector.load %arg3[%c3, %c0_5] : memref<8x128xf32, #tpu.memory_space<vmem>>, vector<1x128xf32>
    %c4 = arith.constant 4 : index
    %c0_6 = arith.constant 0 : index
    %5 = vector.load %arg3[%c4, %c0_6] : memref<8x128xf32, #tpu.memory_space<vmem>>, vector<1x128xf32>
    %c0_7 = arith.constant 0 : index
    %c0_8 = arith.constant 0 : index
    %6 = vector.load %arg2[%c0_7, %c0_8] : memref<128x256xf32, #tpu.memory_space<vmem>>, vector<128x128xf32>
    %c0_9 = arith.constant 0 : index
    %c128 = arith.constant 128 : index
    %7 = vector.load %arg2[%c0_9, %c128] : memref<128x256xf32, #tpu.memory_space<vmem>>, vector<128x128xf32>
    %c0_10 = arith.constant 0 : index
    %c0_11 = arith.constant 0 : index
    %8 = vector.load %arg1[%c0_10, %c0_11] : memref<256x128xf32, #tpu.memory_space<vmem>>, vector<256x128xf32>
    %cst = arith.constant dense<0.000000e+00> : vector<8x128xf32>
    %9 = tpu.matmul %0, %8, %cst {dimension_numbers = #tpu.dot_dimension_numbers<[1], [0], [0], [1], [0, 0, 1, 1], [], []>} : vector<8x256xf32>, vector<256x128xf32>, vector<8x128xf32> -> vector<8x128xf32>
    %cst_12 = arith.constant dense<0.000000e+00> : vector<128xf32>
    %10 = vector.multi_reduction <add>, %9, %cst_12 [0] : vector<8x128xf32> to vector<128xf32>
    %11 = vector.shape_cast %10 : vector<128xf32> to vector<1x128xf32>
    %cst_13 = arith.constant 1.250000e-01 : f32
    %12 = vector.broadcast %cst_13 : f32 to vector<1x128xf32>
    %13 = arith.mulf %11, %12 : vector<1x128xf32>
    %14 = arith.mulf %9, %9 : vector<8x128xf32>
    %cst_14 = arith.constant dense<0.000000e+00> : vector<128xf32>
    %15 = vector.multi_reduction <add>, %14, %cst_14 [0] : vector<8x128xf32> to vector<128xf32>
    %16 = vector.shape_cast %15 : vector<128xf32> to vector<1x128xf32>
    %cst_15 = arith.constant 1.250000e-01 : f32
    %17 = vector.broadcast %cst_15 : f32 to vector<1x128xf32>
    %18 = arith.mulf %16, %17 : vector<1x128xf32>
    %19 = arith.mulf %13, %13 : vector<1x128xf32>
    %20 = arith.subf %18, %19 : vector<1x128xf32>
    %cst_16 = arith.constant 9.99999974E-6 : f32
    %21 = vector.broadcast %cst_16 : f32 to vector<1x128xf32>
    %22 = arith.addf %20, %21 : vector<1x128xf32>
    %23 = math.rsqrt %22 : vector<1x128xf32>
    %24 = arith.mulf %1, %23 : vector<1x128xf32>
    %25 = arith.mulf %13, %24 : vector<1x128xf32>
    %26 = arith.subf %2, %25 : vector<1x128xf32>
    %27 = vector.broadcast %24 : vector<1x128xf32> to vector<8x128xf32>
    %28 = arith.mulf %9, %27 : vector<8x128xf32>
    %29 = vector.broadcast %26 : vector<1x128xf32> to vector<8x128xf32>
    %30 = arith.addf %28, %29 : vector<8x128xf32>
    %cst_17 = arith.constant 0.000000e+00 : f32
    %31 = vector.broadcast %cst_17 : f32 to vector<8x128xf32>
    %32 = arith.maximumf %30, %31 : vector<8x128xf32>
    %cst_18 = arith.constant dense<0.000000e+00> : vector<8x128xf32>
    %33 = tpu.matmul %32, %6, %cst_18 {dimension_numbers = #tpu.dot_dimension_numbers<[1], [0], [0], [1], [0, 0, 1, 1], [], []>} : vector<8x128xf32>, vector<128x128xf32>, vector<8x128xf32> -> vector<8x128xf32>
    %cst_19 = arith.constant dense<0.000000e+00> : vector<128xf32>
    %34 = vector.multi_reduction <add>, %33, %cst_19 [0] : vector<8x128xf32> to vector<128xf32>
    %35 = vector.shape_cast %34 : vector<128xf32> to vector<1x128xf32>
    %cst_20 = arith.constant 1.250000e-01 : f32
    %36 = vector.broadcast %cst_20 : f32 to vector<1x128xf32>
    %37 = arith.mulf %35, %36 : vector<1x128xf32>
    %38 = arith.mulf %33, %33 : vector<8x128xf32>
    %cst_21 = arith.constant dense<0.000000e+00> : vector<128xf32>
    %39 = vector.multi_reduction <add>, %38, %cst_21 [0] : vector<8x128xf32> to vector<128xf32>
    %40 = vector.shape_cast %39 : vector<128xf32> to vector<1x128xf32>
    %cst_22 = arith.constant 1.250000e-01 : f32
    %41 = vector.broadcast %cst_22 : f32 to vector<1x128xf32>
    %42 = arith.mulf %40, %41 : vector<1x128xf32>
    %43 = arith.mulf %37, %37 : vector<1x128xf32>
    %44 = arith.subf %42, %43 : vector<1x128xf32>
    %cst_23 = arith.constant 9.99999974E-6 : f32
    %45 = vector.broadcast %cst_23 : f32 to vector<1x128xf32>
    %46 = arith.addf %44, %45 : vector<1x128xf32>
    %47 = math.rsqrt %46 : vector<1x128xf32>
    %48 = arith.mulf %3, %47 : vector<1x128xf32>
    %49 = arith.mulf %37, %48 : vector<1x128xf32>
    %50 = arith.subf %4, %49 : vector<1x128xf32>
    %51 = vector.broadcast %48 : vector<1x128xf32> to vector<8x128xf32>
    %52 = arith.mulf %33, %51 : vector<8x128xf32>
    %53 = vector.broadcast %50 : vector<1x128xf32> to vector<8x128xf32>
    %54 = arith.addf %52, %53 : vector<8x128xf32>
    %cst_24 = arith.constant 0.000000e+00 : f32
    %55 = vector.broadcast %cst_24 : f32 to vector<8x128xf32>
    %56 = arith.maximumf %54, %55 : vector<8x128xf32>
    %cst_25 = arith.constant dense<0.000000e+00> : vector<8x128xf32>
    %57 = tpu.matmul %56, %7, %cst_25 {dimension_numbers = #tpu.dot_dimension_numbers<[1], [0], [0], [1], [0, 0, 1, 1], [], []>} : vector<8x128xf32>, vector<128x128xf32>, vector<8x128xf32> -> vector<8x128xf32>
    %58 = vector.broadcast %5 : vector<1x128xf32> to vector<8x128xf32>
    %59 = arith.addf %57, %58 : vector<8x128xf32>
    %cst_26 = arith.constant dense<0xFF800000> : vector<8xf32>
    %60 = vector.multi_reduction <maximumf>, %59, %cst_26 [1] : vector<8x128xf32> to vector<8xf32>
    %61 = vector.shape_cast %60 : vector<8xf32> to vector<8x1xf32>
    %62 = vector.broadcast %61 : vector<8x1xf32> to vector<8x128xf32>
    %63 = arith.subf %59, %62 : vector<8x128xf32>
    %64 = math.exp %63 : vector<8x128xf32>
    %cst_27 = arith.constant dense<0.000000e+00> : vector<8xf32>
    %65 = vector.multi_reduction <add>, %64, %cst_27 [1] : vector<8x128xf32> to vector<8xf32>
    %66 = vector.shape_cast %65 : vector<8xf32> to vector<8x1xf32>
    %67 = math.log %66 : vector<8x1xf32>
    %68 = vector.broadcast %67 : vector<8x1xf32> to vector<8x128xf32>
    %69 = arith.subf %63, %68 : vector<8x128xf32>
    %c0_28 = arith.constant 0 : index
    %c0_29 = arith.constant 0 : index
    %70 = vector.load %arg4[%c0_28, %c0_29] : memref<8x128xf32, #tpu.memory_space<vmem>>, vector<8x128xf32>
    tpu.vector_store %arg4[%c0_28, %c0_29], %69 {strides = array<i32>} : memref<8x128xf32, #tpu.memory_space<vmem>>, vector<8x128xf32>,
    return
  }
}

</mosaic_0001>

<bundles_post_ra>
// kernel: tpu_custom_call.1
= control target key start
LH: loop header
LB: loop body
LE: loop exit
PB: predicated region body
PF: predicated region fallthrough
CT: control target
= control target key end

     0   :  { %9 = vsyncpa [#allocation3], 0  ;;  %s526_s0 = inlined_call_operand.hbm [shape: f32[8,256], index: 0, kind: input, shape index: {}]   ;;  %s527_s1 = inlined_call_operand.hbm [shape: f32[256,128], index: 1, kind: input, shape index: {}]   ;;  %s528_s2 = inlined_call_operand.hbm [shape: f32[128,256], index: 2, kind: input, shape index: {}]   ;;  %s529_s3 = inlined_call_operand.hbm [shape: f32[8,128], index: 3, kind: input, shape index: {}]   ;;  %s530_s4 = inlined_call_operand.hbm [shape: f32[8,128], index: 4, kind: output, shape index: {}]  }
   0x1   :  { %10 = vsyncpa [#allocation6], 0 }
   0x2   :  { %11 = vsyncpa [#allocation9], 0  ;;  %s28_s17 = sshll.u32 %s527_s1, 4  ;;  %s29_s17 = int_to_ptr.hbm [resolvable:$true] %s28_s17 }
   0x3   :  { %12 = vsyncpa [#allocation4], 0  ;;  %s477_s18 = smov [#allocation5]   ;;  %s18_s22 = sshll.u32 %s526_s0, 4  ;;  %s19_s22 = int_to_ptr.hbm [resolvable:$true] %s18_s22 }
   0x4   :  { %s30_s19 = sshll.u32 %s477_s18, 4  ;;  %s478_s23 = smov 128   ;;  %s31_s19 = int_to_ptr.vmem [resolvable:$true] %s30_s19 }
   0x5   :  { %s479_s24 = smov 8   ;;  %s480_s25 = smov [#allocation2]  }
   0x6   :  { %36 = dma.hbm_to_vmem [thread:$0]  %s29_s17, 4096, %s31_s19, [#allocation6], %s478_s23, %s478_s23, %s479_s24  }
   0x7   :  { %s20_s26 = sshll.u32 %s480_s25, 4  ;;  %s41_s29 = sshll.u32 %s528_s2, 4  ;;  %s21_s26 = int_to_ptr.vmem [resolvable:$true] %s20_s26  ;;  %s42_s29 = int_to_ptr.hbm [resolvable:$true] %s41_s29 }
   0x8   :  { %23 = dma.hbm_to_vmem [thread:$0]  %s19_s22, 256, %s21_s26, [#allocation3]  }
   0x9   :  { %s481_s1 = smov [#allocation7]   ;;  %s55_s0 = sshll.u32 %s529_s3, 4  ;;  %s56_s0 = int_to_ptr.hbm [resolvable:$true] %s55_s0 }
   0xa   :  { %s43_s30 = sshll.u32 %s481_s1, 4  ;;  %s482_s7 = smov 256   ;;  %s44_s30 = int_to_ptr.vmem [resolvable:$true] %s43_s30 }
   0xb   :  { %s483_s8 = smov 16   ;;  %s484_s9 = smov [#allocation8]  }
   0xc   :  { %49 = dma.hbm_to_vmem [thread:$0]  %s42_s29, 4096, %s44_s30, [#allocation6], %s482_s7, %s482_s7, %s483_s8  }
   0xd   :  { %s57_s10 = sshll.u32 %s484_s9, 4  ;;  %s58_s10 = int_to_ptr.vmem [resolvable:$true] %s57_s10 }
   0xe   :  { %60 = dma.hbm_to_vmem [thread:$0]  %s56_s0, 128, %s58_s10, [#allocation9]  }
   0xf   :  { %469 = dma.done.wait [#allocation3], 256  }
  0x10   :  { %470 = vsyncadd [#allocation3], 4294967040 }
  0x11   :  { %471 = dma.done.wait [#allocation6], 8192  }
  0x12   :  { %472 = vsyncadd [#allocation6], 4294959104 }
  0x13   :  { %473 = dma.done.wait [#allocation9], 128  }
  0x14   :  { %474 = vsyncadd [#allocation9], 4294967168  ;;  %v131_v0 = vld [vmem:[#allocation5 + $0x78] sm:$0xff]  ;;  %v130_v2 = vld [vmem:[#allocation5 + $0x70] sm:$0xff]  ;;  %s485_s2 = smov [#allocation10]   ;;  %s319_s13 = sshll.u32 %s530_s4, 4  ;;  %s320_s13 = int_to_ptr.hbm [resolvable:$true] %s319_s13 }
  0x15   :  { %v147_v1 = vld [vmem:[#allocation5 + $0xf8] sm:$0xff]  ;;  %148 = vmatpush.msra.mxu0 %v131_v0  ;;  %v146_v3 = vld [vmem:[#allocation5 + $0xf0] sm:$0xff]  ;;  %v129_v4 = vld [vmem:[#allocation5 + $0x68] sm:$0xff]  ;;  %s317_s3 = sshll.u32 %s485_s2, 4  ;;  %s318_s3 = int_to_ptr.vmem [resolvable:$true] %s317_s3 }
  0x16   :  { %168 = vmatpush.msra.mxu1 %v147_v1  ;;  %v145_v5 = vld [vmem:[#allocation5 + $0xe8] sm:$0xff]  ;;  %v128_v6 = vld [vmem:[#allocation5 + $0x60] sm:$0xff]  ;;  %v127_v8 = vld [vmem:[#allocation5 + $0x58] sm:$0xff] }
  0x17   :  { %149 = vmatpush.msra.mxu0 %v130_v2  ;;  %v144_v7 = vld [vmem:[#allocation5 + $0xe0] sm:$0xff]  ;;  %v143_v9 = vld [vmem:[#allocation5 + $0xd8] sm:$0xff]  ;;  %v126_v10 = vld [vmem:[#allocation5 + $0x50] sm:$0xff] }
  0x18   :  { %169 = vmatpush.msra.mxu1 %v146_v3  ;;  %v142_v11 = vld [vmem:[#allocation5 + $0xd0] sm:$0xff]  ;;  %v125_v12 = vld [vmem:[#allocation5 + $0x48] sm:$0xff]  ;;  %v124_v14 = vld [vmem:[#allocation5 + $0x40] sm:$0xff] }
  0x19   :  { %150 = vmatpush.msra.mxu0 %v129_v4  ;;  %v141_v13 = vld [vmem:[#allocation5 + $0xc8] sm:$0xff]  ;;  %v140_v15 = vld [vmem:[#allocation5 + $0xc0] sm:$0xff]  ;;  %v123_v16 = vld [vmem:[#allocation5 + $0x38] sm:$0xff] }
  0x1a   :  { %170 = vmatpush.msra.mxu1 %v145_v5  ;;  %v139_v17 = vld [vmem:[#allocation5 + $0xb8] sm:$0xff]  ;;  %v122_v18 = vld [vmem:[#allocation5 + $0x30] sm:$0xff]  ;;  %v121_v20 = vld [vmem:[#allocation5 + $0x28] sm:$0xff] }
  0x1b   :  { %151 = vmatpush.msra.mxu0 %v128_v6  ;;  %v138_v19 = vld [vmem:[#allocation5 + $0xb0] sm:$0xff]  ;;  %v137_v21 = vld [vmem:[#allocation5 + $0xa8] sm:$0xff]  ;;  %v120_v22 = vld [vmem:[#allocation5 + $0x20] sm:$0xff] }
  0x1c   :  { %171 = vmatpush.msra.mxu1 %v144_v7  ;;  %v136_v23 = vld [vmem:[#allocation5 + $0xa0] sm:$0xff]  ;;  %v119_v24 = vld [vmem:[#allocation5 + $0x18] sm:$0xff]  ;;  %v118_v26 = vld [vmem:[#allocation5 + $0x10] sm:$0xff] }
  0x1d   :  { %152 = vmatpush.msra.mxu0 %v127_v8  ;;  %v135_v25 = vld [vmem:[#allocation5 + $0x98] sm:$0xff]  ;;  %v134_v27 = vld [vmem:[#allocation5 + $0x90] sm:$0xff]  ;;  %v117_v28 = vld [vmem:[#allocation5 + $0x8] sm:$0xff] }
  0x1e   :  { %172 = vmatpush.msra.mxu1 %v143_v9  ;;  %v133_v29 = vld [vmem:[#allocation5 + $0x88] sm:$0xff]  ;;  %v116_v30 = vld [vmem:[#allocation5] sm:$0xff]  ;;  %v77_v32 = vld [vmem:[#allocation2] sm:$0xff] }
  0x1f   :  { %153 = vmatpush.msra.mxu0 %v126_v10  ;;  %v132_v31 = vld [vmem:[#allocation5 + $0x80] sm:$0xff]  ;;  %v78_v33 = vld [vmem:[#allocation2 + $0x8] sm:$0xff]  ;;  %v99_v34 = vld [vmem:[#allocation7 + $0xf0] sm:$0xff] }
  0x20   :  { %173 = vmatpush.msra.mxu1 %v142_v11  ;;  %v98_v35 = vld [vmem:[#allocation7 + $0xe0] sm:$0xff]  ;;  %224 = vmatpush.msra.mxu2 %v99_v34  ;;  %v97_v36 = vld [vmem:[#allocation7 + $0xd0] sm:$0xff]  ;;  %v108_v34 = vld [vmem:[#allocation7 + $0x88] sm:$0xff] }
  0x21   :  { %154 = vmatpush.msra.mxu0 %v125_v12  ;;  %v96_v37 = vld [vmem:[#allocation7 + $0xc0] sm:$0xff]  ;;  %v95_v38 = vld [vmem:[#allocation7 + $0xb0] sm:$0xff] }
  0x22   :  { %174 = vmatpush.msra.mxu1 %v141_v13  ;;  %225 = vmatpush.msra.mxu2 %v98_v35  ;;  %v94_v39 = vld [vmem:[#allocation7 + $0xa0] sm:$0xff]  ;;  %v93_v40 = vld [vmem:[#allocation7 + $0x90] sm:$0xff] }
  0x23   :  { %155 = vmatpush.msra.mxu0 %v124_v14  ;;  %v92_v41 = vld [vmem:[#allocation7 + $0x80] sm:$0xff]  ;;  %v91_v42 = vld [vmem:[#allocation7 + $0x70] sm:$0xff] }
  0x24   :  { %175 = vmatpush.msra.mxu1 %v140_v15  ;;  %226 = vmatpush.msra.mxu2 %v97_v36  ;;  %v90_v43 = vld [vmem:[#allocation7 + $0x60] sm:$0xff]  ;;  %v89_v47 = vld [vmem:[#allocation7 + $0x50] sm:$0xff] }
  0x25   :  { %156 = vmatpush.msra.mxu0 %v123_v16  ;;  %v88_v50 = vld [vmem:[#allocation7 + $0x40] sm:$0xff]  ;;  %v87_v53 = vld [vmem:[#allocation7 + $0x30] sm:$0xff] }
  0x26   :  { %176 = vmatpush.msra.mxu1 %v139_v17  ;;  %227 = vmatpush.msra.mxu2 %v96_v37  ;;  %v86_v56 = vld [vmem:[#allocation7 + $0x20] sm:$0xff]  ;;  %v85_v59 = vld [vmem:[#allocation7 + $0x10] sm:$0xff]  ;;  %v107_v37 = vld [vmem:[#allocation7 + $0x78] sm:$0xff] }
  0x27   :  { %157 = vmatpush.msra.mxu0 %v122_v18  ;;  %v84_v61 = vld [vmem:[#allocation7] sm:$0xff] }
  0x28   :  { %177 = vmatpush.msra.mxu1 %v138_v19  ;;  %228 = vmatpush.msra.mxu2 %v95_v38  ;;  %v79_v12 = vld [vmem:[#allocation8] sm:$0x1]  ;;  %v80_v16 = vld [vmem:[#allocation8 + $0x1] sm:$0x1] }
  0x29   :  { %158 = vmatpush.msra.mxu0 %v121_v20 }
  0x2a   :  { %178 = vmatpush.msra.mxu1 %v137_v21  ;;  %229 = vmatpush.msra.mxu2 %v94_v39 }
  0x2b   :  { %159 = vmatpush.msra.mxu0 %v120_v22 }
  0x2c   :  { %179 = vmatpush.msra.mxu1 %v136_v23  ;;  %230 = vmatpush.msra.mxu2 %v93_v40  ;;  %v106_v40 = vld [vmem:[#allocation7 + $0x68] sm:$0xff] }
  0x2d   :  { %160 = vmatpush.msra.mxu0 %v119_v24  ;;  %v115_v24 = vld [vmem:[#allocation7 + $0xf8] sm:$0xff] }
  0x2e   :  { %180 = vmatpush.msra.mxu1 %v135_v25  ;;  %231 = vmatpush.msra.mxu2 %v92_v41  ;;  %v114_v25 = vld [vmem:[#allocation7 + $0xe8] sm:$0xff] }
  0x2f   :  { %161 = vmatpush.msra.mxu0 %v118_v26  ;;  %281 = vmatpush.msra.mxu3 %v115_v24  ;;  %v113_v26 = vld [vmem:[#allocation7 + $0xd8] sm:$0xff] }
  0x30   :  { %181 = vmatpush.msra.mxu1 %v134_v27  ;;  %232 = vmatpush.msra.mxu2 %v91_v42  ;;  %v112_v27 = vld [vmem:[#allocation7 + $0xc8] sm:$0xff] }
  0x31   :  { %162 = vmatpush.msra.mxu0 %v117_v28  ;;  %282 = vmatpush.msra.mxu3 %v114_v25  ;;  %v111_v28 = vld [vmem:[#allocation7 + $0xb8] sm:$0xff] }
  0x32   :  { %182 = vmatpush.msra.mxu1 %v133_v29  ;;  %233 = vmatpush.msra.mxu2 %v90_v43  ;;  %v110_v29 = vld [vmem:[#allocation7 + $0xa8] sm:$0xff]  ;;  %v105_v43 = vld [vmem:[#allocation7 + $0x58] sm:$0xff] }
  0x33   :  { %163 = vmatpush.msra.mxu0 %v116_v30  ;;  %283 = vmatpush.msra.mxu3 %v113_v26  ;;  %v109_v30 = vld [vmem:[#allocation7 + $0x98] sm:$0xff] }
  0x34   :  { %183 = vmatpush.msra.mxu1 %v132_v31  ;;  %164 = vmatmul.f32.vlgmr.msra.gmra.mxu0 %v77_v32 }
  0x35   :  { %184 = vmatmul.f32.vlgmr.msra.gmra.mxu1 %v78_v33  ;;  %234 = vmatpush.msra.mxu2 %v89_v47 }
  0x36   :  { %284 = vmatpush.msra.mxu3 %v112_v27 }
  0x37   :  { %235 = vmatpush.msra.mxu2 %v88_v50  ;;  %v102_v50 = vld [vmem:[#allocation7 + $0x28] sm:$0xff] }
  0x38   :  { %285 = vmatpush.msra.mxu3 %v111_v28 }
  0x39   :  { %236 = vmatpush.msra.mxu2 %v87_v53  ;;  %v101_v53 = vld [vmem:[#allocation7 + $0x18] sm:$0xff] }
  0x3a   :  { %286 = vmatpush.msra.mxu3 %v110_v29 }
  0x3b   :  { %237 = vmatpush.msra.mxu2 %v86_v56  ;;  %v100_v56 = vld [vmem:[#allocation7 + $0x8] sm:$0xff] }
  0x3c   :  { %287 = vmatpush.msra.mxu3 %v109_v30 }
  0x3d   :  { %238 = vmatpush.msra.mxu2 %v85_v59 }
  0x3e   :  { %288 = vmatpush.msra.mxu3 %v108_v34 }
  0x3f   :  { %239 = vmatpush.msra.mxu2 %v84_v61 }
  0x40   :  { %289 = vmatpush.msra.mxu3 %v107_v37 }
  0x42   :  { %290 = vmatpush.msra.mxu3 %v106_v40 }
  0x44   :  { %291 = vmatpush.msra.mxu3 %v105_v43 }
  0xb1   :  { %v165_v44 = vpop.f32.mrf.mxu0 }
  0xb2   :  { %v185_v45 = vpop.f32.mrf.mxu1 }
  0xb3   :  { %v186_v46 = vadd.f32 %v185_v45, %v165_v44 }
  0xb5   :  { %v188_v48 = vrot.slane %v186_v46, 4  ;;  %v195_v49 = vmul.f32 %v186_v46, %v186_v46 }
  0xb7   :  { %v189_v51 = vadd.f32 %v188_v48, %v186_v46  ;;  %v196_v52 = vrot.slane %v195_v49, 4 }
  0xb9   :  { %v190_v54 = vrot.slane %v189_v51, 2  ;;  %v197_v55 = vadd.f32 %v196_v52, %v195_v49  ;;  %v103_v49 = vld [vmem:[#allocation7 + $0x38] sm:$0xff] }
  0xbb   :  { %v191_v57 = vadd.f32 %v190_v54, %v189_v51  ;;  %v198_v58 = vrot.slane %v197_v55, 2 }
  0xbd   :  { %v199_v60 = vadd.f32 %v198_v58, %v197_v55  ;;  %v192_v62 = vrot.slane %v191_v57, 1 }
  0xbf   :  { %v200_v63 = vrot.slane %v199_v60, 1  ;;  %v193_v0 = vadd.f32 %v192_v62, %v191_v57 }
  0xc1   :  { %v201_v1 = vadd.f32 %v200_v63, %v199_v60  ;;  %v194_v2 = vmul.f32 0.125, %v193_v0  ;;  %v81_v0 = vld [vmem:[#allocation8 + $0x2] sm:$0x1] }
  0xc3   :  { %v202_v3 = vmul.f32 0.125, %v201_v1  ;;  %v203_v4 = vmul.f32 %v194_v2, %v194_v2 }
  0xc5   :  { %v204_v5 = vsub.f32 %v202_v3, %v203_v4  ;;  %v82_v4 = vld [vmem:[#allocation8 + $0x3] sm:$0x1] }
  0xc7   :  { %v205_v6 = vadd.f32 1e-05, %v204_v5 }
  0xc9   :  { %341 = vrsqrt.f32 %v205_v6  ;;  %vm212_vm1 = vweird.f32 %v205_v6 }
  0xcf   :  { %v342_v7 = vpop.eup %341 }
  0xd0   :  { %v207_v8 = vmul.f32 %v342_v7, %v205_v6  ;;  %vm213_vm0 = vweird.f32 %v342_v7 }
  0xd1   :  { %vm214_vm2 = vmor %vm212_vm1, %vm213_vm0 }
  0xd2   :  { %v208_v9 = vmul.f32 %v342_v7, %v207_v8 }
  0xd4   :  { %v209_v10 = vmul.f32 0.5, %v208_v9 }
  0xd6   :  { %v210_v11 = vsub.f32 1.5, %v209_v10 }
  0xd8   :  { %v211_v13 = vmul.f32 %v342_v7, %v210_v11 }
  0xda   :  { %v215_v14 = vsel %vm214_vm2, %v342_v7, %v211_v13 }
  0xdb   :  { %v216_v15 = vmul.f32 %v215_v14, %v79_v12  ;;  %v340_v12 = vld [vmem:[#allocation8 + $0x4] ss:$0 sm:$0xff] }
  0xdd   :  { %v217_v17 = vmul.f32 %v216_v15, %v194_v2  ;;  %v219_v18 = vperm.slane %v216_v15, 0 }
  0xdf   :  { %v218_v19 = vsub.f32 %v80_v16, %v217_v17  ;;  %v220_v20 = vmul.f32 %v219_v18, %v186_v46  ;;  %v104_v46 = vld [vmem:[#allocation7 + $0x48] sm:$0xff] }
  0xe0   :  { %292 = vmatpush.msra.mxu3 %v104_v46 }
  0xe1   :  { %v221_v21 = vperm.slane %v218_v19, 0 }
  0xe2   :  { %293 = vmatpush.msra.mxu3 %v103_v49 }
  0xe3   :  { %v222_v22 = vadd.f32 %v221_v21, %v220_v20 }
  0xe4   :  { %294 = vmatpush.msra.mxu3 %v102_v50 }
  0xe5   :  { %v223_v23 = vmax.f32 %v222_v22, 0.0 }
  0xe6   :  { %295 = vmatpush.msra.mxu3 %v101_v53 }
  0xe7   :  { %240 = vmatmul.f32.vlgmr.msra.gmra.mxu2 %v223_v23 }
  0xe8   :  { %296 = vmatpush.msra.mxu3 %v100_v56 }
 0x16a   :  { %v241_v31 = vpop.f32.mrf.mxu2 }
 0x16b   :  { %v244_v32 = vrot.slane %v241_v31, 4  ;;  %v251_v33 = vmul.f32 %v241_v31, %v241_v31 }
 0x16d   :  { %v245_v35 = vadd.f32 %v244_v32, %v241_v31  ;;  %v252_v36 = vrot.slane %v251_v33, 4 }
 0x16f   :  { %v246_v38 = vrot.slane %v245_v35, 2  ;;  %v253_v39 = vadd.f32 %v252_v36, %v251_v33 }
 0x171   :  { %v247_v41 = vadd.f32 %v246_v38, %v245_v35  ;;  %v254_v42 = vrot.slane %v253_v39, 2 }
 0x173   :  { %v248_v44 = vrot.slane %v247_v41, 1  ;;  %v255_v45 = vadd.f32 %v254_v42, %v253_v39 }
 0x175   :  { %v249_v47 = vadd.f32 %v248_v44, %v247_v41  ;;  %v256_v48 = vrot.slane %v255_v45, 1 }
 0x177   :  { %v250_v51 = vmul.f32 0.125, %v249_v47  ;;  %v257_v52 = vadd.f32 %v256_v48, %v255_v45 }
 0x179   :  { %v258_v54 = vmul.f32 0.125, %v257_v52  ;;  %v259_v55 = vmul.f32 %v250_v51, %v250_v51 }
 0x17b   :  { %v260_v57 = vsub.f32 %v258_v54, %v259_v55 }
 0x17d   :  { %v261_v58 = vadd.f32 1e-05, %v260_v57 }
 0x17f   :  { %343 = vrsqrt.f32 %v261_v58  ;;  %vm268_vm4 = vweird.f32 %v261_v58 }
 0x185   :  { %v344_v59 = vpop.eup %343 }
 0x186   :  { %v263_v60 = vmul.f32 %v344_v59, %v261_v58  ;;  %vm269_vm3 = vweird.f32 %v344_v59 }
 0x187   :  { %vm270_vm5 = vmor %vm268_vm4, %vm269_vm3 }
 0x188   :  { %v264_v61 = vmul.f32 %v344_v59, %v263_v60 }
 0x18a   :  { %v265_v62 = vmul.f32 0.5, %v264_v61 }
 0x18c   :  { %v266_v63 = vsub.f32 1.5, %v265_v62 }
 0x18e   :  { %v267_v1 = vmul.f32 %v344_v59, %v266_v63 }
 0x190   :  { %v271_v2 = vsel %vm270_vm5, %v344_v59, %v267_v1 }
 0x191   :  { %v272_v3 = vmul.f32 %v271_v2, %v81_v0 }
 0x193   :  { %v275_v5 = vperm.slane %v272_v3, 0  ;;  %v273_v6 = vmul.f32 %v272_v3, %v250_v51 }
 0x195   :  { %v274_v7 = vsub.f32 %v82_v4, %v273_v6  ;;  %v276_v8 = vmul.f32 %v275_v5, %v241_v31 }
 0x197   :  { %v277_v9 = vperm.slane %v274_v7, 0 }
 0x199   :  { %v278_v10 = vadd.f32 %v277_v9, %v276_v8 }
 0x19b   :  { %v279_v11 = vmax.f32 %v278_v10, 0.0 }
 0x19d   :  { %297 = vmatmul.f32.vlgmr.msra.gmra.mxu3 %v279_v11 }
 0x220   :  { %v298_v13 = vpop.f32.mrf.mxu3 }
 0x221   :  { %v299_v14 = vadd.f32 %v340_v12, %v298_v13 }
 0x223   :  { %301 = vmax.xlane.f32.xlu0 %v299_v14 }
 0x296   :  { %v302_v15 = vpop.xlane.xlu0 %301 }
 0x297   :  { %v303_v16 = vsub.f32 %v299_v14, %v302_v15 }
 0x299   :  { %v304_v17 = vmul.f32 1.442695, %v303_v16 }
 0x29b   :  { %345 = vpow2.f32 %v304_v17 }
 0x2a1   :  { %v346_v18 = vpop.eup %345 }
 0x2a2   :  { %306 = vadd.xlane.f32.xlu0 %v346_v18 }
 0x315   :  { %v307_v19 = vpop.xlane.xlu0 %306 }
 0x316   :  { %347 = vlog2.f32 %v307_v19 }
 0x31c   :  { %v348_v20 = vpop.eup %347 }
 0x31d   :  { %v309_v21 = vmul.f32 0.6931472, %v348_v20 }
 0x31f   :  { %v310_v22 = vsub.f32 %v303_v16, %v309_v21 }
 0x321   :  { %311 = vst [vmem:[#allocation10] sm:$0xff] %v310_v22 }
 0x322   :  { %322 = dma.vmem_to_hbm [thread:$0]  %s318_s3, 128, %s320_s13, [#allocation4]  }
 0x323   :  { %475 = dma.done.wait [#allocation4], 128  }
 0x324   :  { %476 = vsyncadd [#allocation4], 4294967168 }
 0x325   :  { %327 = vsyncpa [#allocation3], 1 }
 0x326   :  { %328 = vsyncpa [#allocation6], 1 }
 0x327   :  { %329 = vsyncpa [#allocation9], 1 }
 0x328   :  { %330 = vsyncpa [#allocation4], 1 }

</bundles_post_ra>
